<compile_context>
chip_gen: v5e
topology: v5e:2x2
jax: 0.10.0
libtpu: 0.0.40
codegen_flags: <defaults>
</compile_context>

<pallas_src>
import jax
import jax.numpy as jnp
from jax.experimental import pallas as pl
from jax.experimental.pallas import tpu as pltpu

_LANES = 1024                     # lane-dense last dim (large multiple of 128 -> unmasked vst)
_TILE_TARGET_BYTES = 4 << 20      # ~4 MiB per tile: near the v6e roofline knee, amortizes
                                  # the ~0.35us/step overhead on v7x's 3.2 TB/s HBM
_VMEM_LIMIT_BYTES = 48 << 20      # covers 2x double-buffered 4-8 MiB tiles on every gen
_PALLAS_MIN_SIZE = 64 * 1024      # elements (~256 KiB f32): below this, plain JAX add wins


def _row_multiple(dtype) -> int:
    """Packed sublane-tile row multiple: 8 for 4-byte, 16 for 2-byte, 32 for 1-byte."""
    return max(8, 32 // jnp.dtype(dtype).itemsize)


def _add_one_kernel(x_ref, o_ref):
    # Elementwise hot path on the VPU, computed in the input dtype (no f32 upcast).
    o_ref[...] = x_ref[...] + jnp.asarray(1, dtype=x_ref.dtype)


def _add_one_2d(x2d: jax.Array) -> jax.Array:
    """Tiled, software-pipelined x + 1 on a 2-D slab (rows, lanes)."""
    rows, lanes = x2d.shape
    itemsize = jnp.dtype(x2d.dtype).itemsize
    rm = _row_multiple(x2d.dtype)

    # ~_TILE_TARGET_BYTES per tile, rows a multiple of the packed sublane tile.
    target_rows = max(_TILE_TARGET_BYTES // (lanes * itemsize), rm)
    block_rows = max((target_rows // rm) * rm, rm)
    if block_rows >= rows:
        block_rows = rows          # full extent: always a legal block shape

    grid = (pl.cdiv(rows, block_rows),)
    nbytes = rows * lanes * itemsize

    return pl.pallas_call(
        _add_one_kernel,
        out_shape=jax.ShapeDtypeStruct(x2d.shape, x2d.dtype),
        grid=grid,
        in_specs=[pl.BlockSpec((block_rows, lanes), lambda i: (i, 0))],
        out_specs=pl.BlockSpec((block_rows, lanes), lambda i: (i, 0)),
        compiler_params=pltpu.CompilerParams(
            # "parallel" lets the row grid shard across v7x's two TensorCores;
            # near-zero impact (but harmless) on single-TC v5e/v6e.
            dimension_semantics=("parallel",),
            vmem_limit_bytes=_VMEM_LIMIT_BYTES,
        ),
        cost_estimate=pl.CostEstimate(
            flops=rows * lanes, transcendentals=0, bytes_accessed=2 * nbytes),
    )(x2d)


@jax.jit
def _forward_pallas(x: jax.Array) -> jax.Array:
    """Pallas path: only free (bitcast) reshapes around the kernel — no pad/slice copies."""
    orig_shape = x.shape
    n = x.size

    if n % _LANES == 0:
        # Row-major flatten to a lane-dense (rows, 1024) slab; pure bitcast, no copy.
        x2d = x.reshape(n // _LANES, _LANES)
        return _add_one_2d(x2d).reshape(orig_shape)

    if x.ndim >= 2:
        # Collapse leading dims (free) and keep the full-extent last dim.
        # Non-128-multiple last dims just use masked stores in-kernel, which is far
        # cheaper than an extra HBM pad/slice round trip.
        rows = n // orig_shape[-1]
        x2d = x.reshape(rows, orig_shape[-1])
        return _add_one_2d(x2d).reshape(orig_shape)

    # Truly ragged 1-D flat: kernel on the aligned prefix, plain JAX add on the short tail.
    n_main = (n // _LANES) * _LANES
    head = _add_one_2d(x[:n_main].reshape(n_main // _LANES, _LANES)).reshape(-1)
    tail = x[n_main:] + jnp.asarray(1, x.dtype)
    return jnp.concatenate([head, tail])


def neural_network_forward(x: jax.Array) -> jax.Array:
    """Mirrors NeuralNetwork.forward: outputs = inputs + 1 (shape & dtype preserved)."""
    x = jnp.asarray(x)
    # Scalar / small inputs: XLA's fused elementwise add is already at HBM roofline;
    # a Pallas launch would be a net regression here.
    if x.ndim == 0 or x.size < _PALLAS_MIN_SIZE:
        return x + jnp.asarray(1, dtype=x.dtype)
    return _forward_pallas(x)


if __name__ == "__main__":
    # The module's reference input: torch.tensor(1.0) — a 0-d float32 scalar (JAX path).
    x0 = jnp.array(1.0, dtype=jnp.float32)
    out0 = jax.block_until_ready(neural_network_forward(x0))
    assert out0.shape == x0.shape and out0.dtype == x0.dtype, (out0.shape, out0.dtype)
    assert jnp.allclose(out0, 2.0), (out0,)

    key = jax.random.PRNGKey(0)
    k_f32, k_bf16 = jax.random.split(key)

    # f32 input large enough to exercise the Pallas kernel (lane-dense n % 1024 == 0 path).
    xf = jax.random.normal(k_f32, (2, 4, 128, 128), dtype=jnp.float32)   # 131072 elems
    outf = jax.block_until_ready(neural_network_forward(xf))
    assert outf.shape == xf.shape and outf.dtype == xf.dtype
    assert jnp.allclose(outf, xf + 1.0)

    # bf16 stays bf16; compare against a bf16-computed reference with bf16 tolerance
    # (previous failure: f32 reference + default tight tolerance).
    xbf = jax.random.normal(k_bf16, (128, 1024), dtype=jnp.bfloat16)     # 131072 elems
    outbf = jax.block_until_ready(neural_network_forward(xbf))
    assert outbf.shape == xbf.shape and outbf.dtype == jnp.bfloat16
    refbf = xbf + jnp.asarray(1, dtype=jnp.bfloat16)
    assert jnp.allclose(outbf.astype(jnp.float32), refbf.astype(jnp.float32),
                        rtol=1e-2, atol=1e-2)

    print("KERNEL_OK")
</pallas_src>

<mosaic_0001>
module attributes {stable_mosaic.version = 11 : i64} {
  func.func @_add_one_kernel(%arg0: i32, %arg1: memref<128x1024xf32, #tpu.memory_space<vmem>>, %arg2: memref<128x1024xf32, #tpu.memory_space<vmem>>) attributes {dimension_semantics = [#tpu.dimension_semantics<parallel>], iteration_bounds = array<i64: 1>, scalar_prefetch = 0 : i64, scratch_operands = 0 : i64, tpu.core_type = #tpu.core_type<tc>, window_params = [{transform_indices = @transform_0, window_bounds = array<i64: 128, 1024>}, {transform_indices = @transform_1, window_bounds = array<i64: 128, 1024>}]} {
    %c0 = arith.constant 0 : index
    %c0_0 = arith.constant 0 : index
    %0 = vector.load %arg1[%c0, %c0_0] : memref<128x1024xf32, #tpu.memory_space<vmem>>, vector<128x1024xf32>
    %cst = arith.constant 1.000000e+00 : f32
    %1 = vector.broadcast %cst : f32 to vector<128x1024xf32>
    %2 = arith.addf %0, %1 : vector<128x1024xf32>
    %c0_1 = arith.constant 0 : index
    %c0_2 = arith.constant 0 : index
    %3 = vector.load %arg2[%c0_1, %c0_2] : memref<128x1024xf32, #tpu.memory_space<vmem>>, vector<128x1024xf32>
    tpu.vector_store %arg2[%c0_1, %c0_2], %2 {strides = array<i32>} : memref<128x1024xf32, #tpu.memory_space<vmem>>, vector<128x1024xf32>,
    return
  }
  func.func @transform_0(%arg0: i32) -> (i32, i32) {
    %c0_i32 = arith.constant 0 : i32
    %c0_i32_0 = arith.constant 0 : i32
    return %arg0, %c0_i32 : i32, i32
  }
  func.func @transform_1(%arg0: i32) -> (i32, i32) {
    %c0_i32 = arith.constant 0 : i32
    %c0_i32_0 = arith.constant 0 : i32
    return %arg0, %c0_i32 : i32, i32
  }
}

</mosaic_0001>

<bundles_post_ra>
// kernel: _forward_pallas.1
= control target key start
LH: loop header
LB: loop body
LE: loop exit
PB: predicated region body
PF: predicated region fallthrough
CT: control target
= control target key end

     0   :  { %s1174_s0 = inlined_call_operand.vmem [shape: f32[128,1024], index: 0, kind: input, shape index: {}]   ;;  %s1175_s1 = inlined_call_operand.vmem [shape: f32[128,1024], index: 1, kind: output, shape index: {}]  }
   0x1   :  { %v8_v0 = vld [vmem:[%s1174_s0] sm:$0xff]  ;;  %v9_v1 = vld [vmem:[%s1174_s0 + $0x8] sm:$0xff]  ;;  %v10_v2 = vld [vmem:[%s1174_s0 + $0x10] sm:$0xff] }
   0x2   :  { %v136_v3 = vadd.f32 1.0, %v8_v0  ;;  %v137_v4 = vadd.f32 1.0, %v9_v1  ;;  %v138_v5 = vadd.f32 1.0, %v10_v2  ;;  %v11_v6 = vld [vmem:[%s1174_s0 + $0x18] sm:$0xff]  ;;  %v12_v7 = vld [vmem:[%s1174_s0 + $0x20] sm:$0xff]  ;;  %v13_v8 = vld [vmem:[%s1174_s0 + $0x28] sm:$0xff] }
   0x3   :  { %v139_v9 = vadd.f32 1.0, %v11_v6  ;;  %v14_v10 = vld [vmem:[%s1174_s0 + $0x30] sm:$0xff]  ;;  %v140_v11 = vadd.f32 1.0, %v12_v7  ;;  %v15_v12 = vld [vmem:[%s1174_s0 + $0x38] sm:$0xff]  ;;  %v141_v13 = vadd.f32 1.0, %v13_v8  ;;  %v16_v14 = vld [vmem:[%s1174_s0 + $0x40] sm:$0xff] }
   0x4   :  { %264 = vst [vmem:[%s1175_s1] sm:$0xff] %v136_v3  ;;  %v142_v15 = vadd.f32 1.0, %v14_v10  ;;  %v17_v16 = vld [vmem:[%s1174_s0 + $0x48] sm:$0xff]  ;;  %v143_v17 = vadd.f32 1.0, %v15_v12  ;;  %v18_v18 = vld [vmem:[%s1174_s0 + $0x50] sm:$0xff]  ;;  %v144_v19 = vadd.f32 1.0, %v16_v14  ;;  %v19_v20 = vld [vmem:[%s1174_s0 + $0x58] sm:$0xff] }
   0x5   :  { %265 = vst [vmem:[%s1175_s1 + $0x8] sm:$0xff] %v137_v4  ;;  %v145_v21 = vadd.f32 1.0, %v17_v16  ;;  %v20_v22 = vld [vmem:[%s1174_s0 + $0x60] sm:$0xff]  ;;  %v146_v23 = vadd.f32 1.0, %v18_v18  ;;  %v21_v24 = vld [vmem:[%s1174_s0 + $0x68] sm:$0xff]  ;;  %v147_v25 = vadd.f32 1.0, %v19_v20 }
   0x6   :  { %266 = vst [vmem:[%s1175_s1 + $0x10] sm:$0xff] %v138_v5  ;;  %v22_v26 = vld [vmem:[%s1174_s0 + $0x70] sm:$0xff]  ;;  %v148_v27 = vadd.f32 1.0, %v20_v22  ;;  %v23_v28 = vld [vmem:[%s1174_s0 + $0x78] sm:$0xff]  ;;  %v149_v29 = vadd.f32 1.0, %v21_v24  ;;  %v24_v30 = vld [vmem:[%s1174_s0 + $0x80] sm:$0xff] }
   0x7   :  { %267 = vst [vmem:[%s1175_s1 + $0x18] sm:$0xff] %v139_v9  ;;  %v150_v31 = vadd.f32 1.0, %v22_v26  ;;  %v25_v32 = vld [vmem:[%s1174_s0 + $0x88] sm:$0xff]  ;;  %v151_v33 = vadd.f32 1.0, %v23_v28  ;;  %v26_v34 = vld [vmem:[%s1174_s0 + $0x90] sm:$0xff]  ;;  %v152_v35 = vadd.f32 1.0, %v24_v30 }
   0x8   :  { %268 = vst [vmem:[%s1175_s1 + $0x20] sm:$0xff] %v140_v11  ;;  %v27_v36 = vld [vmem:[%s1174_s0 + $0x98] sm:$0xff]  ;;  %v153_v37 = vadd.f32 1.0, %v25_v32  ;;  %v28_v38 = vld [vmem:[%s1174_s0 + $0xa0] sm:$0xff]  ;;  %v154_v39 = vadd.f32 1.0, %v26_v34  ;;  %v29_v40 = vld [vmem:[%s1174_s0 + $0xa8] sm:$0xff] }
   0x9   :  { %269 = vst [vmem:[%s1175_s1 + $0x28] sm:$0xff] %v141_v13  ;;  %v155_v41 = vadd.f32 1.0, %v27_v36  ;;  %v30_v42 = vld [vmem:[%s1174_s0 + $0xb0] sm:$0xff]  ;;  %v156_v43 = vadd.f32 1.0, %v28_v38  ;;  %v31_v44 = vld [vmem:[%s1174_s0 + $0xb8] sm:$0xff]  ;;  %v157_v45 = vadd.f32 1.0, %v29_v40 }
   0xa   :  { %270 = vst [vmem:[%s1175_s1 + $0x30] sm:$0xff] %v142_v15  ;;  %v32_v46 = vld [vmem:[%s1174_s0 + $0xc0] sm:$0xff]  ;;  %v158_v47 = vadd.f32 1.0, %v30_v42  ;;  %v33_v48 = vld [vmem:[%s1174_s0 + $0xc8] sm:$0xff]  ;;  %v159_v49 = vadd.f32 1.0, %v31_v44  ;;  %v34_v50 = vld [vmem:[%s1174_s0 + $0xd0] sm:$0xff] }
   0xb   :  { %271 = vst [vmem:[%s1175_s1 + $0x38] sm:$0xff] %v143_v17  ;;  %v160_v51 = vadd.f32 1.0, %v32_v46  ;;  %v35_v52 = vld [vmem:[%s1174_s0 + $0xd8] sm:$0xff]  ;;  %v161_v53 = vadd.f32 1.0, %v33_v48  ;;  %v36_v54 = vld [vmem:[%s1174_s0 + $0xe0] sm:$0xff]  ;;  %v162_v55 = vadd.f32 1.0, %v34_v50 }
   0xc   :  { %272 = vst [vmem:[%s1175_s1 + $0x40] sm:$0xff] %v144_v19  ;;  %v37_v56 = vld [vmem:[%s1174_s0 + $0xe8] sm:$0xff]  ;;  %v163_v57 = vadd.f32 1.0, %v35_v52  ;;  %v38_v58 = vld [vmem:[%s1174_s0 + $0xf0] sm:$0xff]  ;;  %v164_v59 = vadd.f32 1.0, %v36_v54  ;;  %v39_v60 = vld [vmem:[%s1174_s0 + $0xf8] sm:$0xff] }
   0xd   :  { %273 = vst [vmem:[%s1175_s1 + $0x48] sm:$0xff] %v145_v21  ;;  %v165_v61 = vadd.f32 1.0, %v37_v56  ;;  %v40_v62 = vld [vmem:[%s1174_s0 + $0x100] sm:$0xff]  ;;  %v166_v63 = vadd.f32 1.0, %v38_v58  ;;  %v41_v0 = vld [vmem:[%s1174_s0 + $0x108] sm:$0xff]  ;;  %v167_v1 = vadd.f32 1.0, %v39_v60 }
   0xe   :  { %274 = vst [vmem:[%s1175_s1 + $0x50] sm:$0xff] %v146_v23  ;;  %v42_v2 = vld [vmem:[%s1174_s0 + $0x110] sm:$0xff]  ;;  %v168_v3 = vadd.f32 1.0, %v40_v62  ;;  %v43_v4 = vld [vmem:[%s1174_s0 + $0x118] sm:$0xff]  ;;  %v169_v5 = vadd.f32 1.0, %v41_v0  ;;  %v44_v6 = vld [vmem:[%s1174_s0 + $0x120] sm:$0xff] }
   0xf   :  { %275 = vst [vmem:[%s1175_s1 + $0x58] sm:$0xff] %v147_v25  ;;  %v170_v7 = vadd.f32 1.0, %v42_v2  ;;  %v45_v8 = vld [vmem:[%s1174_s0 + $0x128] sm:$0xff]  ;;  %v171_v9 = vadd.f32 1.0, %v43_v4  ;;  %v46_v10 = vld [vmem:[%s1174_s0 + $0x130] sm:$0xff]  ;;  %v172_v11 = vadd.f32 1.0, %v44_v6 }
  0x10   :  { %276 = vst [vmem:[%s1175_s1 + $0x60] sm:$0xff] %v148_v27  ;;  %v47_v12 = vld [vmem:[%s1174_s0 + $0x138] sm:$0xff]  ;;  %v173_v13 = vadd.f32 1.0, %v45_v8  ;;  %v48_v14 = vld [vmem:[%s1174_s0 + $0x140] sm:$0xff]  ;;  %v174_v15 = vadd.f32 1.0, %v46_v10  ;;  %v49_v16 = vld [vmem:[%s1174_s0 + $0x148] sm:$0xff] }
  0x11   :  { %277 = vst [vmem:[%s1175_s1 + $0x68] sm:$0xff] %v149_v29  ;;  %v175_v17 = vadd.f32 1.0, %v47_v12  ;;  %v50_v18 = vld [vmem:[%s1174_s0 + $0x150] sm:$0xff]  ;;  %v176_v19 = vadd.f32 1.0, %v48_v14  ;;  %v51_v20 = vld [vmem:[%s1174_s0 + $0x158] sm:$0xff]  ;;  %v177_v21 = vadd.f32 1.0, %v49_v16 }
  0x12   :  { %278 = vst [vmem:[%s1175_s1 + $0x70] sm:$0xff] %v150_v31  ;;  %v52_v22 = vld [vmem:[%s1174_s0 + $0x160] sm:$0xff]  ;;  %v178_v23 = vadd.f32 1.0, %v50_v18  ;;  %v53_v24 = vld [vmem:[%s1174_s0 + $0x168] sm:$0xff]  ;;  %v179_v25 = vadd.f32 1.0, %v51_v20  ;;  %v54_v26 = vld [vmem:[%s1174_s0 + $0x170] sm:$0xff] }
  0x13   :  { %279 = vst [vmem:[%s1175_s1 + $0x78] sm:$0xff] %v151_v33  ;;  %v180_v27 = vadd.f32 1.0, %v52_v22  ;;  %v55_v28 = vld [vmem:[%s1174_s0 + $0x178] sm:$0xff]  ;;  %v181_v29 = vadd.f32 1.0, %v53_v24  ;;  %v56_v30 = vld [vmem:[%s1174_s0 + $0x180] sm:$0xff]  ;;  %v182_v31 = vadd.f32 1.0, %v54_v26 }
  0x14   :  { %280 = vst [vmem:[%s1175_s1 + $0x80] sm:$0xff] %v152_v35  ;;  %v57_v32 = vld [vmem:[%s1174_s0 + $0x188] sm:$0xff]  ;;  %v183_v33 = vadd.f32 1.0, %v55_v28  ;;  %v58_v34 = vld [vmem:[%s1174_s0 + $0x190] sm:$0xff]  ;;  %v184_v35 = vadd.f32 1.0, %v56_v30  ;;  %v59_v36 = vld [vmem:[%s1174_s0 + $0x198] sm:$0xff] }
  0x15   :  { %281 = vst [vmem:[%s1175_s1 + $0x88] sm:$0xff] %v153_v37  ;;  %v185_v37 = vadd.f32 1.0, %v57_v32  ;;  %v60_v38 = vld [vmem:[%s1174_s0 + $0x1a0] sm:$0xff]  ;;  %v61_v40 = vld [vmem:[%s1174_s0 + $0x1a8] sm:$0xff]  ;;  %v62_v42 = vld [vmem:[%s1174_s0 + $0x1b0] sm:$0xff] }
  0x16   :  { %282 = vst [vmem:[%s1175_s1 + $0x90] sm:$0xff] %v154_v39  ;;  %v186_v39 = vadd.f32 1.0, %v58_v34  ;;  %v63_v44 = vld [vmem:[%s1174_s0 + $0x1b8] sm:$0xff]  ;;  %v64_v46 = vld [vmem:[%s1174_s0 + $0x1c0] sm:$0xff]  ;;  %v65_v48 = vld [vmem:[%s1174_s0 + $0x1c8] sm:$0xff] }
  0x17   :  { %283 = vst [vmem:[%s1175_s1 + $0x98] sm:$0xff] %v155_v41  ;;  %v187_v41 = vadd.f32 1.0, %v59_v36  ;;  %v66_v50 = vld [vmem:[%s1174_s0 + $0x1d0] sm:$0xff]  ;;  %v67_v52 = vld [vmem:[%s1174_s0 + $0x1d8] sm:$0xff]  ;;  %v68_v54 = vld [vmem:[%s1174_s0 + $0x1e0] sm:$0xff] }
  0x18   :  { %284 = vst [vmem:[%s1175_s1 + $0xa0] sm:$0xff] %v156_v43  ;;  %v188_v43 = vadd.f32 1.0, %v60_v38  ;;  %v69_v56 = vld [vmem:[%s1174_s0 + $0x1e8] sm:$0xff]  ;;  %v70_v58 = vld [vmem:[%s1174_s0 + $0x1f0] sm:$0xff]  ;;  %v71_v60 = vld [vmem:[%s1174_s0 + $0x1f8] sm:$0xff] }
  0x19   :  { %285 = vst [vmem:[%s1175_s1 + $0xa8] sm:$0xff] %v157_v45  ;;  %v189_v45 = vadd.f32 1.0, %v61_v40  ;;  %v72_v62 = vld [vmem:[%s1174_s0 + $0x200] sm:$0xff]  ;;  %v73_v0 = vld [vmem:[%s1174_s0 + $0x208] sm:$0xff]  ;;  %v74_v2 = vld [vmem:[%s1174_s0 + $0x210] sm:$0xff] }
  0x1a   :  { %286 = vst [vmem:[%s1175_s1 + $0xb0] sm:$0xff] %v158_v47  ;;  %v190_v47 = vadd.f32 1.0, %v62_v42  ;;  %v75_v4 = vld [vmem:[%s1174_s0 + $0x218] sm:$0xff]  ;;  %v76_v6 = vld [vmem:[%s1174_s0 + $0x220] sm:$0xff]  ;;  %v77_v8 = vld [vmem:[%s1174_s0 + $0x228] sm:$0xff] }
  0x1b   :  { %287 = vst [vmem:[%s1175_s1 + $0xb8] sm:$0xff] %v159_v49  ;;  %v191_v49 = vadd.f32 1.0, %v63_v44  ;;  %v78_v10 = vld [vmem:[%s1174_s0 + $0x230] sm:$0xff]  ;;  %v79_v12 = vld [vmem:[%s1174_s0 + $0x238] sm:$0xff]  ;;  %v80_v14 = vld [vmem:[%s1174_s0 + $0x240] sm:$0xff] }
  0x1c   :  { %288 = vst [vmem:[%s1175_s1 + $0xc0] sm:$0xff] %v160_v51  ;;  %v192_v51 = vadd.f32 1.0, %v64_v46  ;;  %v81_v16 = vld [vmem:[%s1174_s0 + $0x248] sm:$0xff]  ;;  %v82_v18 = vld [vmem:[%s1174_s0 + $0x250] sm:$0xff]  ;;  %v83_v20 = vld [vmem:[%s1174_s0 + $0x258] sm:$0xff] }
  0x1d   :  { %289 = vst [vmem:[%s1175_s1 + $0xc8] sm:$0xff] %v161_v53  ;;  %v193_v53 = vadd.f32 1.0, %v65_v48  ;;  %v84_v22 = vld [vmem:[%s1174_s0 + $0x260] sm:$0xff]  ;;  %v85_v24 = vld [vmem:[%s1174_s0 + $0x268] sm:$0xff]  ;;  %v86_v26 = vld [vmem:[%s1174_s0 + $0x270] sm:$0xff] }
  0x1e   :  { %290 = vst [vmem:[%s1175_s1 + $0xd0] sm:$0xff] %v162_v55  ;;  %v194_v55 = vadd.f32 1.0, %v66_v50  ;;  %v87_v28 = vld [vmem:[%s1174_s0 + $0x278] sm:$0xff]  ;;  %v88_v30 = vld [vmem:[%s1174_s0 + $0x280] sm:$0xff]  ;;  %v89_v32 = vld [vmem:[%s1174_s0 + $0x288] sm:$0xff] }
  0x1f   :  { %291 = vst [vmem:[%s1175_s1 + $0xd8] sm:$0xff] %v163_v57  ;;  %v195_v57 = vadd.f32 1.0, %v67_v52  ;;  %v90_v34 = vld [vmem:[%s1174_s0 + $0x290] sm:$0xff]  ;;  %v91_v36 = vld [vmem:[%s1174_s0 + $0x298] sm:$0xff]  ;;  %v92_v38 = vld [vmem:[%s1174_s0 + $0x2a0] sm:$0xff] }
  0x20   :  { %292 = vst [vmem:[%s1175_s1 + $0xe0] sm:$0xff] %v164_v59  ;;  %v196_v59 = vadd.f32 1.0, %v68_v54  ;;  %v93_v40 = vld [vmem:[%s1174_s0 + $0x2a8] sm:$0xff]  ;;  %v94_v42 = vld [vmem:[%s1174_s0 + $0x2b0] sm:$0xff]  ;;  %v95_v44 = vld [vmem:[%s1174_s0 + $0x2b8] sm:$0xff] }
  0x21   :  { %293 = vst [vmem:[%s1175_s1 + $0xe8] sm:$0xff] %v165_v61  ;;  %v197_v61 = vadd.f32 1.0, %v69_v56  ;;  %v96_v46 = vld [vmem:[%s1174_s0 + $0x2c0] sm:$0xff]  ;;  %v97_v48 = vld [vmem:[%s1174_s0 + $0x2c8] sm:$0xff]  ;;  %v98_v50 = vld [vmem:[%s1174_s0 + $0x2d0] sm:$0xff] }
  0x22   :  { %294 = vst [vmem:[%s1175_s1 + $0xf0] sm:$0xff] %v166_v63  ;;  %v198_v63 = vadd.f32 1.0, %v70_v58  ;;  %v99_v52 = vld [vmem:[%s1174_s0 + $0x2d8] sm:$0xff]  ;;  %v100_v54 = vld [vmem:[%s1174_s0 + $0x2e0] sm:$0xff]  ;;  %v101_v56 = vld [vmem:[%s1174_s0 + $0x2e8] sm:$0xff] }
  0x23   :  { %295 = vst [vmem:[%s1175_s1 + $0xf8] sm:$0xff] %v167_v1  ;;  %v199_v1 = vadd.f32 1.0, %v71_v60  ;;  %v102_v58 = vld [vmem:[%s1174_s0 + $0x2f0] sm:$0xff]  ;;  %v103_v60 = vld [vmem:[%s1174_s0 + $0x2f8] sm:$0xff] }
  0x24   :  { %296 = vst [vmem:[%s1175_s1 + $0x100] sm:$0xff] %v168_v3  ;;  %v200_v3 = vadd.f32 1.0, %v72_v62  ;;  %v104_v62 = vld [vmem:[%s1174_s0 + $0x300] sm:$0xff] }
  0x25   :  { %297 = vst [vmem:[%s1175_s1 + $0x108] sm:$0xff] %v169_v5  ;;  %v201_v5 = vadd.f32 1.0, %v73_v0  ;;  %v105_v0 = vld [vmem:[%s1174_s0 + $0x308] sm:$0xff] }
  0x26   :  { %298 = vst [vmem:[%s1175_s1 + $0x110] sm:$0xff] %v170_v7  ;;  %v202_v7 = vadd.f32 1.0, %v74_v2  ;;  %v106_v2 = vld [vmem:[%s1174_s0 + $0x310] sm:$0xff] }
  0x27   :  { %299 = vst [vmem:[%s1175_s1 + $0x118] sm:$0xff] %v171_v9  ;;  %v203_v9 = vadd.f32 1.0, %v75_v4  ;;  %v107_v4 = vld [vmem:[%s1174_s0 + $0x318] sm:$0xff] }
  0x28   :  { %300 = vst [vmem:[%s1175_s1 + $0x120] sm:$0xff] %v172_v11  ;;  %v204_v11 = vadd.f32 1.0, %v76_v6  ;;  %v108_v6 = vld [vmem:[%s1174_s0 + $0x320] sm:$0xff] }
  0x29   :  { %301 = vst [vmem:[%s1175_s1 + $0x128] sm:$0xff] %v173_v13  ;;  %v205_v13 = vadd.f32 1.0, %v77_v8  ;;  %v109_v8 = vld [vmem:[%s1174_s0 + $0x328] sm:$0xff] }
  0x2a   :  { %302 = vst [vmem:[%s1175_s1 + $0x130] sm:$0xff] %v174_v15  ;;  %v206_v15 = vadd.f32 1.0, %v78_v10  ;;  %v110_v10 = vld [vmem:[%s1174_s0 + $0x330] sm:$0xff] }
  0x2b   :  { %303 = vst [vmem:[%s1175_s1 + $0x138] sm:$0xff] %v175_v17  ;;  %v207_v17 = vadd.f32 1.0, %v79_v12  ;;  %v111_v12 = vld [vmem:[%s1174_s0 + $0x338] sm:$0xff] }
  0x2c   :  { %304 = vst [vmem:[%s1175_s1 + $0x140] sm:$0xff] %v176_v19  ;;  %v208_v19 = vadd.f32 1.0, %v80_v14  ;;  %v112_v14 = vld [vmem:[%s1174_s0 + $0x340] sm:$0xff] }
  0x2d   :  { %305 = vst [vmem:[%s1175_s1 + $0x148] sm:$0xff] %v177_v21  ;;  %v209_v21 = vadd.f32 1.0, %v81_v16  ;;  %v113_v16 = vld [vmem:[%s1174_s0 + $0x348] sm:$0xff] }
  0x2e   :  { %306 = vst [vmem:[%s1175_s1 + $0x150] sm:$0xff] %v178_v23  ;;  %v210_v23 = vadd.f32 1.0, %v82_v18  ;;  %v114_v18 = vld [vmem:[%s1174_s0 + $0x350] sm:$0xff] }
  0x2f   :  { %307 = vst [vmem:[%s1175_s1 + $0x158] sm:$0xff] %v179_v25  ;;  %v211_v25 = vadd.f32 1.0, %v83_v20  ;;  %v115_v20 = vld [vmem:[%s1174_s0 + $0x358] sm:$0xff] }
  0x30   :  { %308 = vst [vmem:[%s1175_s1 + $0x160] sm:$0xff] %v180_v27  ;;  %v212_v27 = vadd.f32 1.0, %v84_v22  ;;  %v116_v22 = vld [vmem:[%s1174_s0 + $0x360] sm:$0xff] }
  0x31   :  { %309 = vst [vmem:[%s1175_s1 + $0x168] sm:$0xff] %v181_v29  ;;  %v213_v29 = vadd.f32 1.0, %v85_v24  ;;  %v117_v24 = vld [vmem:[%s1174_s0 + $0x368] sm:$0xff] }
  0x32   :  { %310 = vst [vmem:[%s1175_s1 + $0x170] sm:$0xff] %v182_v31  ;;  %v214_v31 = vadd.f32 1.0, %v86_v26  ;;  %v118_v26 = vld [vmem:[%s1174_s0 + $0x370] sm:$0xff] }
  0x33   :  { %311 = vst [vmem:[%s1175_s1 + $0x178] sm:$0xff] %v183_v33  ;;  %v215_v33 = vadd.f32 1.0, %v87_v28  ;;  %v119_v28 = vld [vmem:[%s1174_s0 + $0x378] sm:$0xff] }
  0x34   :  { %312 = vst [vmem:[%s1175_s1 + $0x180] sm:$0xff] %v184_v35  ;;  %v216_v35 = vadd.f32 1.0, %v88_v30  ;;  %v120_v30 = vld [vmem:[%s1174_s0 + $0x380] sm:$0xff] }
  0x35   :  { %313 = vst [vmem:[%s1175_s1 + $0x188] sm:$0xff] %v185_v37  ;;  %v217_v37 = vadd.f32 1.0, %v89_v32  ;;  %v121_v32 = vld [vmem:[%s1174_s0 + $0x388] sm:$0xff] }
  0x36   :  { %314 = vst [vmem:[%s1175_s1 + $0x190] sm:$0xff] %v186_v39  ;;  %v218_v39 = vadd.f32 1.0, %v90_v34  ;;  %v122_v34 = vld [vmem:[%s1174_s0 + $0x390] sm:$0xff] }
  0x37   :  { %315 = vst [vmem:[%s1175_s1 + $0x198] sm:$0xff] %v187_v41  ;;  %v219_v41 = vadd.f32 1.0, %v91_v36  ;;  %v123_v36 = vld [vmem:[%s1174_s0 + $0x398] sm:$0xff] }
  0x38   :  { %316 = vst [vmem:[%s1175_s1 + $0x1a0] sm:$0xff] %v188_v43  ;;  %v220_v43 = vadd.f32 1.0, %v92_v38  ;;  %v124_v38 = vld [vmem:[%s1174_s0 + $0x3a0] sm:$0xff] }
  0x39   :  { %317 = vst [vmem:[%s1175_s1 + $0x1a8] sm:$0xff] %v189_v45  ;;  %v221_v45 = vadd.f32 1.0, %v93_v40  ;;  %v125_v40 = vld [vmem:[%s1174_s0 + $0x3a8] sm:$0xff] }
  0x3a   :  { %318 = vst [vmem:[%s1175_s1 + $0x1b0] sm:$0xff] %v190_v47  ;;  %v222_v47 = vadd.f32 1.0, %v94_v42  ;;  %v126_v42 = vld [vmem:[%s1174_s0 + $0x3b0] sm:$0xff] }
  0x3b   :  { %319 = vst [vmem:[%s1175_s1 + $0x1b8] sm:$0xff] %v191_v49  ;;  %v223_v49 = vadd.f32 1.0, %v95_v44  ;;  %v127_v44 = vld [vmem:[%s1174_s0 + $0x3b8] sm:$0xff] }
  0x3c   :  { %320 = vst [vmem:[%s1175_s1 + $0x1c0] sm:$0xff] %v192_v51  ;;  %v224_v51 = vadd.f32 1.0, %v96_v46  ;;  %v128_v46 = vld [vmem:[%s1174_s0 + $0x3c0] sm:$0xff] }
  0x3d   :  { %321 = vst [vmem:[%s1175_s1 + $0x1c8] sm:$0xff] %v193_v53  ;;  %v225_v53 = vadd.f32 1.0, %v97_v48  ;;  %v129_v48 = vld [vmem:[%s1174_s0 + $0x3c8] sm:$0xff] }
  0x3e   :  { %322 = vst [vmem:[%s1175_s1 + $0x1d0] sm:$0xff] %v194_v55  ;;  %v226_v55 = vadd.f32 1.0, %v98_v50  ;;  %v130_v50 = vld [vmem:[%s1174_s0 + $0x3d0] sm:$0xff] }
  0x3f   :  { %323 = vst [vmem:[%s1175_s1 + $0x1d8] sm:$0xff] %v195_v57  ;;  %v227_v57 = vadd.f32 1.0, %v99_v52  ;;  %v131_v52 = vld [vmem:[%s1174_s0 + $0x3d8] sm:$0xff] }
  0x40   :  { %324 = vst [vmem:[%s1175_s1 + $0x1e0] sm:$0xff] %v196_v59  ;;  %v228_v59 = vadd.f32 1.0, %v100_v54  ;;  %v132_v54 = vld [vmem:[%s1174_s0 + $0x3e0] sm:$0xff] }
  0x41   :  { %325 = vst [vmem:[%s1175_s1 + $0x1e8] sm:$0xff] %v197_v61  ;;  %v229_v61 = vadd.f32 1.0, %v101_v56  ;;  %v133_v56 = vld [vmem:[%s1174_s0 + $0x3e8] sm:$0xff] }
  0x42   :  { %326 = vst [vmem:[%s1175_s1 + $0x1f0] sm:$0xff] %v198_v63  ;;  %v230_v63 = vadd.f32 1.0, %v102_v58  ;;  %v134_v58 = vld [vmem:[%s1174_s0 + $0x3f0] sm:$0xff] }
  0x43   :  { %327 = vst [vmem:[%s1175_s1 + $0x1f8] sm:$0xff] %v199_v1  ;;  %v231_v1 = vadd.f32 1.0, %v103_v60  ;;  %v135_v60 = vld [vmem:[%s1174_s0 + $0x3f8] sm:$0xff] }
  0x44   :  { %328 = vst [vmem:[%s1175_s1 + $0x200] sm:$0xff] %v200_v3  ;;  %v232_v3 = vadd.f32 1.0, %v104_v62  ;;  %v262_v62 = vadd.f32 1.0, %v134_v58 }
  0x45   :  { %329 = vst [vmem:[%s1175_s1 + $0x208] sm:$0xff] %v201_v5  ;;  %v233_v5 = vadd.f32 1.0, %v105_v0 }
  0x46   :  { %330 = vst [vmem:[%s1175_s1 + $0x210] sm:$0xff] %v202_v7  ;;  %v234_v7 = vadd.f32 1.0, %v106_v2 }
  0x47   :  { %331 = vst [vmem:[%s1175_s1 + $0x218] sm:$0xff] %v203_v9  ;;  %v235_v9 = vadd.f32 1.0, %v107_v4 }
  0x48   :  { %332 = vst [vmem:[%s1175_s1 + $0x220] sm:$0xff] %v204_v11  ;;  %v236_v11 = vadd.f32 1.0, %v108_v6 }
  0x49   :  { %333 = vst [vmem:[%s1175_s1 + $0x228] sm:$0xff] %v205_v13  ;;  %v237_v13 = vadd.f32 1.0, %v109_v8 }
  0x4a   :  { %334 = vst [vmem:[%s1175_s1 + $0x230] sm:$0xff] %v206_v15  ;;  %v238_v15 = vadd.f32 1.0, %v110_v10 }
  0x4b   :  { %335 = vst [vmem:[%s1175_s1 + $0x238] sm:$0xff] %v207_v17  ;;  %v239_v17 = vadd.f32 1.0, %v111_v12 }
  0x4c   :  { %336 = vst [vmem:[%s1175_s1 + $0x240] sm:$0xff] %v208_v19  ;;  %v240_v19 = vadd.f32 1.0, %v112_v14 }
  0x4d   :  { %337 = vst [vmem:[%s1175_s1 + $0x248] sm:$0xff] %v209_v21  ;;  %v241_v21 = vadd.f32 1.0, %v113_v16 }
  0x4e   :  { %338 = vst [vmem:[%s1175_s1 + $0x250] sm:$0xff] %v210_v23  ;;  %v242_v23 = vadd.f32 1.0, %v114_v18 }
  0x4f   :  { %339 = vst [vmem:[%s1175_s1 + $0x258] sm:$0xff] %v211_v25  ;;  %v243_v25 = vadd.f32 1.0, %v115_v20 }
  0x50   :  { %340 = vst [vmem:[%s1175_s1 + $0x260] sm:$0xff] %v212_v27  ;;  %v244_v27 = vadd.f32 1.0, %v116_v22 }
  0x51   :  { %341 = vst [vmem:[%s1175_s1 + $0x268] sm:$0xff] %v213_v29  ;;  %v245_v29 = vadd.f32 1.0, %v117_v24 }
  0x52   :  { %342 = vst [vmem:[%s1175_s1 + $0x270] sm:$0xff] %v214_v31  ;;  %v246_v31 = vadd.f32 1.0, %v118_v26 }
  0x53   :  { %343 = vst [vmem:[%s1175_s1 + $0x278] sm:$0xff] %v215_v33  ;;  %v247_v33 = vadd.f32 1.0, %v119_v28 }
  0x54   :  { %344 = vst [vmem:[%s1175_s1 + $0x280] sm:$0xff] %v216_v35  ;;  %v248_v35 = vadd.f32 1.0, %v120_v30 }
  0x55   :  { %345 = vst [vmem:[%s1175_s1 + $0x288] sm:$0xff] %v217_v37  ;;  %v249_v37 = vadd.f32 1.0, %v121_v32 }
  0x56   :  { %346 = vst [vmem:[%s1175_s1 + $0x290] sm:$0xff] %v218_v39  ;;  %v250_v39 = vadd.f32 1.0, %v122_v34 }
  0x57   :  { %347 = vst [vmem:[%s1175_s1 + $0x298] sm:$0xff] %v219_v41  ;;  %v251_v41 = vadd.f32 1.0, %v123_v36 }
  0x58   :  { %348 = vst [vmem:[%s1175_s1 + $0x2a0] sm:$0xff] %v220_v43  ;;  %v252_v43 = vadd.f32 1.0, %v124_v38 }
  0x59   :  { %349 = vst [vmem:[%s1175_s1 + $0x2a8] sm:$0xff] %v221_v45  ;;  %v253_v45 = vadd.f32 1.0, %v125_v40 }
  0x5a   :  { %350 = vst [vmem:[%s1175_s1 + $0x2b0] sm:$0xff] %v222_v47  ;;  %v254_v47 = vadd.f32 1.0, %v126_v42 }
  0x5b   :  { %351 = vst [vmem:[%s1175_s1 + $0x2b8] sm:$0xff] %v223_v49  ;;  %v255_v49 = vadd.f32 1.0, %v127_v44 }
  0x5c   :  { %352 = vst [vmem:[%s1175_s1 + $0x2c0] sm:$0xff] %v224_v51  ;;  %v256_v51 = vadd.f32 1.0, %v128_v46 }
  0x5d   :  { %353 = vst [vmem:[%s1175_s1 + $0x2c8] sm:$0xff] %v225_v53  ;;  %v257_v53 = vadd.f32 1.0, %v129_v48 }
  0x5e   :  { %354 = vst [vmem:[%s1175_s1 + $0x2d0] sm:$0xff] %v226_v55  ;;  %v258_v55 = vadd.f32 1.0, %v130_v50 }
  0x5f   :  { %355 = vst [vmem:[%s1175_s1 + $0x2d8] sm:$0xff] %v227_v57  ;;  %v259_v57 = vadd.f32 1.0, %v131_v52 }
  0x60   :  { %356 = vst [vmem:[%s1175_s1 + $0x2e0] sm:$0xff] %v228_v59  ;;  %v260_v59 = vadd.f32 1.0, %v132_v54 }
  0x61   :  { %357 = vst [vmem:[%s1175_s1 + $0x2e8] sm:$0xff] %v229_v61  ;;  %v261_v61 = vadd.f32 1.0, %v133_v56 }
  0x62   :  { %358 = vst [vmem:[%s1175_s1 + $0x2f0] sm:$0xff] %v230_v63  ;;  %v263_v63 = vadd.f32 1.0, %v135_v60 }
  0x63   :  { %359 = vst [vmem:[%s1175_s1 + $0x2f8] sm:$0xff] %v231_v1 }
  0x64   :  { %360 = vst [vmem:[%s1175_s1 + $0x300] sm:$0xff] %v232_v3 }
  0x65   :  { %361 = vst [vmem:[%s1175_s1 + $0x308] sm:$0xff] %v233_v5 }
  0x66   :  { %362 = vst [vmem:[%s1175_s1 + $0x310] sm:$0xff] %v234_v7 }
  0x67   :  { %363 = vst [vmem:[%s1175_s1 + $0x318] sm:$0xff] %v235_v9 }
  0x68   :  { %364 = vst [vmem:[%s1175_s1 + $0x320] sm:$0xff] %v236_v11 }
  0x69   :  { %365 = vst [vmem:[%s1175_s1 + $0x328] sm:$0xff] %v237_v13 }
  0x6a   :  { %366 = vst [vmem:[%s1175_s1 + $0x330] sm:$0xff] %v238_v15 }
  0x6b   :  { %367 = vst [vmem:[%s1175_s1 + $0x338] sm:$0xff] %v239_v17 }
  0x6c   :  { %368 = vst [vmem:[%s1175_s1 + $0x340] sm:$0xff] %v240_v19 }
  0x6d   :  { %369 = vst [vmem:[%s1175_s1 + $0x348] sm:$0xff] %v241_v21 }
  0x6e   :  { %370 = vst [vmem:[%s1175_s1 + $0x350] sm:$0xff] %v242_v23 }
  0x6f   :  { %371 = vst [vmem:[%s1175_s1 + $0x358] sm:$0xff] %v243_v25 }
  0x70   :  { %372 = vst [vmem:[%s1175_s1 + $0x360] sm:$0xff] %v244_v27 }
  0x71   :  { %373 = vst [vmem:[%s1175_s1 + $0x368] sm:$0xff] %v245_v29 }
  0x72   :  { %374 = vst [vmem:[%s1175_s1 + $0x370] sm:$0xff] %v246_v31 }
  0x73   :  { %375 = vst [vmem:[%s1175_s1 + $0x378] sm:$0xff] %v247_v33 }
  0x74   :  { %376 = vst [vmem:[%s1175_s1 + $0x380] sm:$0xff] %v248_v35 }
  0x75   :  { %377 = vst [vmem:[%s1175_s1 + $0x388] sm:$0xff] %v249_v37 }
  0x76   :  { %378 = vst [vmem:[%s1175_s1 + $0x390] sm:$0xff] %v250_v39 }
  0x77   :  { %379 = vst [vmem:[%s1175_s1 + $0x398] sm:$0xff] %v251_v41 }
  0x78   :  { %380 = vst [vmem:[%s1175_s1 + $0x3a0] sm:$0xff] %v252_v43 }
  0x79   :  { %381 = vst [vmem:[%s1175_s1 + $0x3a8] sm:$0xff] %v253_v45 }
  0x7a   :  { %382 = vst [vmem:[%s1175_s1 + $0x3b0] sm:$0xff] %v254_v47 }
  0x7b   :  { %383 = vst [vmem:[%s1175_s1 + $0x3b8] sm:$0xff] %v255_v49 }
  0x7c   :  { %384 = vst [vmem:[%s1175_s1 + $0x3c0] sm:$0xff] %v256_v51 }
  0x7d   :  { %385 = vst [vmem:[%s1175_s1 + $0x3c8] sm:$0xff] %v257_v53 }
  0x7e   :  { %386 = vst [vmem:[%s1175_s1 + $0x3d0] sm:$0xff] %v258_v55 }
  0x7f   :  { %387 = vst [vmem:[%s1175_s1 + $0x3d8] sm:$0xff] %v259_v57 }
  0x80   :  { %388 = vst [vmem:[%s1175_s1 + $0x3e0] sm:$0xff] %v260_v59 }
  0x81   :  { %389 = vst [vmem:[%s1175_s1 + $0x3e8] sm:$0xff] %v261_v61 }
  0x82   :  { %390 = vst [vmem:[%s1175_s1 + $0x3f0] sm:$0xff] %v262_v62 }
  0x83   :  { %391 = vst [vmem:[%s1175_s1 + $0x3f8] sm:$0xff] %v263_v63 }

</bundles_post_ra>
